<compile_context>
chip_gen: v5e
topology: v5e:2x2
jax: 0.10.0
libtpu: 0.0.40
codegen_flags: <defaults>
</compile_context>

<pallas_src>
import functools

import jax
import jax.numpy as jnp
import numpy as np
from jax import lax
from jax.experimental import pallas as pl
from jax.experimental.pallas import tpu as pltpu


# --------------------------------------------------------------------------
# Helpers
# --------------------------------------------------------------------------
def _vmem_capacity_bytes():
    try:
        return int(pltpu.get_tpu_info().vmem_capacity_bytes)
    except Exception:
        return 64 * 1024 * 1024        # conservative (v7x per-TC VMEM)


def _pick_tile(dim, target):
    """Largest multiple of 8 <= target dividing dim, else the full dim."""
    if dim <= target:
        return dim
    t = target - (target % 8)
    while t >= 8:
        if dim % t == 0:
            return t
        t -= 8
    return dim


# --------------------------------------------------------------------------
# Kernel A: fused (pre-scaled) QKV projection.
# --------------------------------------------------------------------------
def _qkv_proj_kernel(x_ref, wqkv_ref, bqkv_ref, q_ref, kv_ref):
    x = x_ref[...]                                              # (tt, E)
    qkv = jnp.dot(x, wqkv_ref[...],
                  preferred_element_type=jnp.float32)           # (tt, 3E) f32
    qkv = qkv + bqkv_ref[...]
    E = q_ref.shape[-1]
    q_ref[...] = qkv[:, :E].astype(q_ref.dtype)
    kv_ref[...] = qkv[:, E:].astype(kv_ref.dtype)


# --------------------------------------------------------------------------
# Kernel B: flash attention + output projection + residual + LN + FFN.
# --------------------------------------------------------------------------
def _attn_ffn_kernel(q_ref, kv_ref, xres_ref, wp_ref, bp_ref, w1_ref, b1_ref,
                     w2_ref, b2_ref, gamma_ref, beta_ref, out_ref,
                     m_ref, l_ref, acc_ref, *, n_heads, head_dim,
                     residual_attn, norm_attn, eps, mm_dtype):
    ki = pl.program_id(1)
    E = n_heads * head_dim

    @pl.when(ki == 0)
    def _init():
        m_ref[...] = jnp.full(m_ref.shape, -jnp.inf, dtype=m_ref.dtype)
        l_ref[...] = jnp.zeros(l_ref.shape, dtype=l_ref.dtype)
        acc_ref[...] = jnp.zeros(acc_ref.shape, dtype=acc_ref.dtype)

    q = q_ref[...]                       # (tq, E)  pre-scaled, compute dtype
    kv = kv_ref[...]                     # (tk, 2E) compute dtype

    # Per-head online-softmax update (n_heads static -> unrolled).  Slices are
    # lane-aligned whenever head_dim is a multiple of 128.
    for h in range(n_heads):
        lo = h * head_dim
        q_h = q[:, lo:lo + head_dim]                     # (tq, hd)
        k_h = kv[:, lo:lo + head_dim]                    # (tk, hd)
        v_h = kv[:, E + lo:E + lo + head_dim]            # (tk, hd)

        s = lax.dot_general(q_h, k_h, (((1,), (1,)), ((), ())),
                            preferred_element_type=jnp.float32)  # (tq, tk)

        m_prev = m_ref[:, h:h + 1]                       # (tq, 1)
        m_new = jnp.maximum(m_prev, jnp.max(s, axis=-1, keepdims=True))
        alpha = jnp.exp(m_prev - m_new)
        p = jnp.exp(s - m_new)
        l_ref[:, h:h + 1] = (alpha * l_ref[:, h:h + 1]
                             + jnp.sum(p, axis=-1, keepdims=True))
        acc_ref[:, lo:lo + head_dim] = (
            alpha * acc_ref[:, lo:lo + head_dim]
            + jnp.dot(p.astype(kv.dtype), v_h,
                      preferred_element_type=jnp.float32))
        m_ref[:, h:h + 1] = m_new

    @pl.when(ki == pl.num_programs(1) - 1)
    def _finalize():
        # Normalize per head (exact reciprocal -- cost is negligible here),
        # then a single lane-dense (tq,E)x(E,E) output projection.
        cols = []
        for h in range(n_heads):
            lo = h * head_dim
            inv_l = 1.0 / l_ref[:, h:h + 1]
            cols.append(acc_ref[:, lo:lo + head_dim] * inv_l)
        ctx = jnp.concatenate(cols, axis=-1)                     # (tq, E) f32

        y = jnp.dot(ctx.astype(mm_dtype), wp_ref[...],
                    preferred_element_type=jnp.float32) + bp_ref[...]
        if residual_attn:
            y = y + xres_ref[...].astype(jnp.float32)
        if norm_attn:
            mean = jnp.mean(y, axis=-1, keepdims=True)
            var = jnp.mean(jnp.square(y - mean), axis=-1, keepdims=True)
            y = (y - mean) * lax.rsqrt(var + eps)
            y = y * gamma_ref[...] + beta_ref[...]

        # Feedforward: Linear -> ReLU -> Linear.
        h1 = jnp.dot(y.astype(mm_dtype), w1_ref[...],
                     preferred_element_type=jnp.float32) + b1_ref[...]
        h1 = jnp.maximum(h1, 0.0)
        ff = jnp.dot(h1.astype(mm_dtype), w2_ref[...],
                     preferred_element_type=jnp.float32) + b2_ref[...]
        out_ref[...] = ff.astype(out_ref.dtype)


# --------------------------------------------------------------------------
# Wrapper
# --------------------------------------------------------------------------
def flexible_encoder_layer(x, params, *, n_heads, residual_attn, norm_attn,
                           eps=1e-5, q_tile=None, kv_tile=None,
                           compute_dtype=jnp.bfloat16):
    """x: (S, E) float32.  params: dict of per-head stacked torch-layout weights."""
    S, E = x.shape
    if E % n_heads:
        raise ValueError("embedding_dim must be divisible by n_heads")
    head_dim = E // n_heads
    F = params["w1"].shape[0]
    f32 = jnp.float32

    vmem_cap = _vmem_capacity_bytes()
    default_tile = 512 if vmem_cap >= 100 * 1024 * 1024 else 256
    tq = _pick_tile(S, q_tile if q_tile is not None else default_tile)
    tk = _pick_tile(S, kv_tile if kv_tile is not None else default_tile)
    tt = tq
    # TODO(synk): on v7x, also prefer S // tq >= 2 (even) so both TensorCores
    # receive query tiles under the "parallel" qi axis.

    # ---- host-side weight packing: fused, pre-transposed to (in, out) ------
    scale = 1.0 / (head_dim ** 0.5)

    def fuse_heads(w):        # (H, hd, E) torch (out,in) per head -> (E, H*hd)
        return jnp.transpose(w.astype(f32), (2, 0, 1)).reshape(E, E)

    wq = fuse_heads(params["wq"]) * scale     # 1/sqrt(hd) folded into Wq/bq
    wk = fuse_heads(params["wk"])
    wv = fuse_heads(params["wv"])
    wqkv = jnp.concatenate([wq, wk, wv], axis=1).astype(compute_dtype)  # (E,3E)
    bqkv = jnp.concatenate(
        [params["bq"].astype(f32).reshape(1, E) * scale,
         params["bk"].astype(f32).reshape(1, E),
         params["bv"].astype(f32).reshape(1, E)], axis=1)               # (1,3E)

    wp_t = params["wp"].astype(f32).T.astype(compute_dtype)             # (E, E)
    bp = params["bp"].astype(f32).reshape(1, E)
    w1_t = params["w1"].astype(f32).T.astype(compute_dtype)             # (E, F)
    b1 = params["b1"].astype(f32).reshape(1, F)
    w2_t = params["w2"].astype(f32).T.astype(compute_dtype)             # (F, E)
    b2 = params["b2"].astype(f32).reshape(1, E)
    gamma = params["gamma"].astype(f32).reshape(1, E)
    beta = params["beta"].astype(f32).reshape(1, E)
    x_c = x.astype(compute_dtype)

    # ---- explicit VMEM accounting (2 buffers for tiled operands, 1 for ----
    # ---- single-buffered resident weights, + scratch and f32 temps) -------
    csz = jnp.dtype(compute_dtype).itemsize
    need_a = (2 * tt * E * csz                       # x tile
              + 3 * E * E * csz + 3 * E * 4          # wqkv + bias (resident)
              + 2 * (tt * E + tt * 2 * E) * csz      # q / kv output tiles
              + 2 * tt * 3 * E * 4)                  # f32 matmul temps
    need_b = (2 * tq * E * csz + 2 * tk * 2 * E * csz   # q / kv tiles
              + 2 * tq * E * 4                          # residual x tile (f32)
              + 2 * tq * E * 4                          # output tile (f32)
              + (E * E + 2 * E * F) * csz               # wp, w1, w2 (resident)
              + (5 * E + F) * 4                         # biases, gamma, beta
              + (2 * tq * n_heads + tq * E) * 4         # m, l, acc scratch
              + (2 * tq * tk + tq * F + 2 * tq * E) * 4)  # s/p, ffn hidden, y
    cap = max(vmem_cap - 16 * 1024 * 1024, 32 * 1024 * 1024)

    def vlimit(need):
        return int(min(max(2 * need, 32 * 1024 * 1024), cap))

    kernel_b = functools.partial(
        _attn_ffn_kernel, n_heads=n_heads, head_dim=head_dim,
        residual_attn=residual_attn, norm_attn=norm_attn, eps=eps,
        mm_dtype=compute_dtype)

    def _run(single_buffer_weights):
        if single_buffer_weights:
            def resident(shape):
                nd = len(shape)
                return pl.BlockSpec(shape, lambda *_: (0,) * nd,
                                    pipeline_mode=pl.Buffered(1))
        else:
            def resident(shape):
                nd = len(shape)
                return pl.BlockSpec(shape, lambda *_: (0,) * nd)

        # ---------------- kernel A: QKV projection -------------------------
        q_arr, kv_arr = pl.pallas_call(
            _qkv_proj_kernel,
            out_shape=(jax.ShapeDtypeStruct((S, E), compute_dtype),
                       jax.ShapeDtypeStruct((S, 2 * E), compute_dtype)),
            grid_spec=pltpu.PrefetchScalarGridSpec(
                num_scalar_prefetch=0,
                grid=(S // tt,),
                in_specs=[pl.BlockSpec((tt, E), lambda i: (i, 0)),
                          resident((E, 3 * E)),
                          resident((1, 3 * E))],
                out_specs=(pl.BlockSpec((tt, E), lambda i: (i, 0)),
                           pl.BlockSpec((tt, 2 * E), lambda i: (i, 0))),
            ),
            compiler_params=pltpu.CompilerParams(
                dimension_semantics=("parallel",),
                vmem_limit_bytes=vlimit(need_a)),
        )(x_c, wqkv, bqkv)

        # ---------------- kernel B: flash attention + epilogue -------------
        out = pl.pallas_call(
            kernel_b,
            out_shape=jax.ShapeDtypeStruct((S, E), x.dtype),
            grid_spec=pltpu.PrefetchScalarGridSpec(
                num_scalar_prefetch=0,
                grid=(S // tq, S // tk),
                in_specs=[
                    pl.BlockSpec((tq, E), lambda qi, ki: (qi, 0)),      # Q tile
                    pl.BlockSpec((tk, 2 * E), lambda qi, ki: (ki, 0)),  # KV tile
                    pl.BlockSpec((tq, E), lambda qi, ki: (qi, 0)),      # residual
                    resident((E, E)), resident((1, E)),                 # wp, bp
                    resident((E, F)), resident((1, F)),                 # w1, b1
                    resident((F, E)), resident((1, E)),                 # w2, b2
                    resident((1, E)), resident((1, E)),                 # gamma, beta
                ],
                out_specs=pl.BlockSpec((tq, E), lambda qi, ki: (qi, 0)),
                scratch_shapes=[
                    pltpu.VMEM((tq, n_heads), jnp.float32),   # running max m
                    pltpu.VMEM((tq, n_heads), jnp.float32),   # running sum l
                    pltpu.VMEM((tq, E), jnp.float32),         # lane-dense acc
                ],
            ),
            compiler_params=pltpu.CompilerParams(
                dimension_semantics=("parallel", "arbitrary"),
                vmem_limit_bytes=vlimit(need_b)),
        )(q_arr, kv_arr, x, wp_t, bp, w1_t, b1, w2_t, b2, gamma, beta)
        return jax.block_until_ready(out)

    try:
        return _run(True)
    except Exception:
        # pl.Buffered(1) (single-buffered resident weights) not supported on
        # this jax build -- fall back to default double buffering.  Genuine
        # kernel bugs still surface from the fallback path.
        return _run(False)


# --------------------------------------------------------------------------
# Pure-JAX reference and test
# --------------------------------------------------------------------------
def _ref_forward(x, p, *, n_heads, residual_attn, norm_attn, eps=1e-5):
    E = x.shape[-1]
    hd = E // n_heads
    heads = []
    for h in range(n_heads):
        q = x @ p["wq"][h].T + p["bq"][h]
        k = x @ p["wk"][h].T + p["bk"][h]
        v = x @ p["wv"][h].T + p["bv"][h]
        a = jax.nn.softmax((q @ k.T) / (hd ** 0.5), axis=-1)
        heads.append(a @ v)
    y = jnp.concatenate(heads, -1) @ p["wp"].T + p["bp"]
    if residual_attn:
        y = y + x
    if norm_attn:
        m = y.mean(-1, keepdims=True)
        var = ((y - m) ** 2).mean(-1, keepdims=True)
        y = (y - m) / jnp.sqrt(var + eps) * p["gamma"] + p["beta"]
    h1 = jnp.maximum(y @ p["w1"].T + p["b1"], 0.0)
    return h1 @ p["w2"].T + p["b2"]


def _make_params(key, E, H, F):
    hd = E // H
    ks = jax.random.split(key, 12)

    def uinit(k, shape, fan_in):
        b = 1.0 / (fan_in ** 0.5)
        return jax.random.uniform(k, shape, jnp.float32, -b, b)

    return {
        "wq": uinit(ks[0], (H, hd, E), E), "bq": uinit(ks[1], (H, hd), E),
        "wk": uinit(ks[2], (H, hd, E), E), "bk": uinit(ks[3], (H, hd), E),
        "wv": uinit(ks[4], (H, hd, E), E), "bv": uinit(ks[5], (H, hd), E),
        "wp": uinit(ks[6], (E, E), E), "bp": uinit(ks[7], (1, E), E),
        "w1": uinit(ks[8], (F, E), E), "b1": uinit(ks[9], (1, F), E),
        "w2": uinit(ks[10], (E, F), F), "b2": uinit(ks[11], (1, E), F),
        "gamma": jnp.ones((1, E), jnp.float32),
        "beta": jnp.zeros((1, E), jnp.float32),
    }


if __name__ == "__main__":
    key = jax.random.PRNGKey(0)
    kx1, kp1, kx2, kp2 = jax.random.split(key, 4)

    # 1) Small shapes (full-array blocks), f32 matmuls, tight tolerance now
    #    that the finalize path uses an exact reciprocal.
    S, E, H, F = 8, 32, 4, 64
    x = jax.random.normal(kx1, (S, E), jnp.float32)
    params = _make_params(kp1, E, H, F)
    out = flexible_encoder_layer(x, params, n_heads=H, residual_attn=True,
                                 norm_attn=True, compute_dtype=jnp.float32)
    with jax.default_matmul_precision("highest"):
        ref = _ref_forward(x, params, n_heads=H,
                           residual_attn=True, norm_attn=True)
    np.testing.assert_allclose(np.asarray(out), np.asarray(ref),
                               rtol=1e-4, atol=1e-4)

    # 2) Tiled shapes exercising the flash (qi, ki) grid and ki-reduction
    #    accumulators (S=512, E=256, head_dim=64, grid 4x4), f32.
    S, E, H, F = 512, 256, 4, 512
    x = jax.random.normal(kx2, (S, E), jnp.float32)
    params = _make_params(kp2, E, H, F)
    out = flexible_encoder_layer(x, params, n_heads=H, residual_attn=True,
                                 norm_attn=True, q_tile=128, kv_tile=128,
                                 compute_dtype=jnp.float32)
    with jax.default_matmul_precision("highest"):
        ref = _ref_forward(x, params, n_heads=H,
                           residual_attn=True, norm_attn=True)
    np.testing.assert_allclose(np.asarray(out), np.asarray(ref),
                               rtol=1e-3, atol=1e-3)

    # 3) Same tiled shapes with bf16 MXU matmuls (f32 stats / accumulators).
    out_bf16 = flexible_encoder_layer(x, params, n_heads=H, residual_attn=True,
                                      norm_attn=True, q_tile=128, kv_tile=128,
                                      compute_dtype=jnp.bfloat16)
    np.testing.assert_allclose(np.asarray(out_bf16), np.asarray(ref),
                               rtol=5e-2, atol=5e-2)

    print("KERNEL_OK")
</pallas_src>

<mosaic_0001>
module attributes {stable_mosaic.version = 11 : i64} {
  func.func @_qkv_proj_kernel(%arg0: i32, %arg1: memref<8x32xf32, #tpu.memory_space<vmem>>, %arg2: memref<32x96xf32, #tpu.memory_space<vmem>>, %arg3: memref<1x96xf32, #tpu.memory_space<vmem>>, %arg4: memref<8x32xf32, #tpu.memory_space<vmem>>, %arg5: memref<8x64xf32, #tpu.memory_space<vmem>>) attributes {dimension_semantics = [#tpu.dimension_semantics<parallel>], iteration_bounds = array<i64: 1>, scalar_prefetch = 0 : i64, scratch_operands = 0 : i64, tpu.core_type = #tpu.core_type<tc>, window_params = [{transform_indices = @transform_0, window_bounds = array<i64: 8, 32>}, {pipeline_mode = #tpu.pipeline_mode<synchronous>, transform_indices = @transform_1, window_bounds = array<i64: 32, 96>}, {pipeline_mode = #tpu.pipeline_mode<synchronous>, transform_indices = @transform_2, window_bounds = array<i64: 1, 96>}, {transform_indices = @transform_3, window_bounds = array<i64: 8, 32>}, {transform_indices = @transform_4, window_bounds = array<i64: 8, 64>}]} {
    %c0 = arith.constant 0 : index
    %c0_0 = arith.constant 0 : index
    %0 = vector.load %arg1[%c0, %c0_0] : memref<8x32xf32, #tpu.memory_space<vmem>>, vector<8x32xf32>
    %c0_1 = arith.constant 0 : index
    %c0_2 = arith.constant 0 : index
    %1 = vector.load %arg2[%c0_1, %c0_2] : memref<32x96xf32, #tpu.memory_space<vmem>>, vector<32x96xf32>
    %cst = arith.constant dense<0.000000e+00> : vector<8x96xf32>
    %2 = tpu.matmul %0, %1, %cst {dimension_numbers = #tpu.dot_dimension_numbers<[1], [0], [0], [1], [0, 0, 1, 1], [], []>} : vector<8x32xf32>, vector<32x96xf32>, vector<8x96xf32> -> vector<8x96xf32>
    %c0_3 = arith.constant 0 : index
    %c0_4 = arith.constant 0 : index
    %3 = vector.load %arg3[%c0_3, %c0_4] : memref<1x96xf32, #tpu.memory_space<vmem>>, vector<1x96xf32>
    %4 = vector.broadcast %3 : vector<1x96xf32> to vector<8x96xf32>
    %5 = arith.addf %2, %4 : vector<8x96xf32>
    %6 = vector.extract_strided_slice %5 {offsets = [0, 0], sizes = [8, 32], strides = [1, 1]} : vector<8x96xf32> to vector<8x32xf32>
    %c0_5 = arith.constant 0 : index
    %c0_6 = arith.constant 0 : index
    %7 = vector.load %arg4[%c0_5, %c0_6] : memref<8x32xf32, #tpu.memory_space<vmem>>, vector<8x32xf32>
    tpu.vector_store %arg4[%c0_5, %c0_6], %6 {strides = array<i32>} : memref<8x32xf32, #tpu.memory_space<vmem>>, vector<8x32xf32>,
    %8 = vector.extract_strided_slice %5 {offsets = [0, 32], sizes = [8, 64], strides = [1, 1]} : vector<8x96xf32> to vector<8x64xf32>
    %c0_7 = arith.constant 0 : index
    %c0_8 = arith.constant 0 : index
    %9 = vector.load %arg5[%c0_7, %c0_8] : memref<8x64xf32, #tpu.memory_space<vmem>>, vector<8x64xf32>
    tpu.vector_store %arg5[%c0_7, %c0_8], %8 {strides = array<i32>} : memref<8x64xf32, #tpu.memory_space<vmem>>, vector<8x64xf32>,
    return
  }
  func.func @transform_0(%arg0: i32) -> (i32, i32) {
    %c0_i32 = arith.constant 0 : i32
    %c0_i32_0 = arith.constant 0 : i32
    return %arg0, %c0_i32 : i32, i32
  }
  func.func @transform_1(%arg0: i32) -> (i32, i32) {
    %c0_i32 = arith.constant 0 : i32
    %c0_i32_0 = arith.constant 0 : i32
    %c0_i32_1 = arith.constant 0 : i32
    return %c0_i32, %c0_i32_0 : i32, i32
  }
  func.func @transform_2(%arg0: i32) -> (i32, i32) {
    %c0_i32 = arith.constant 0 : i32
    %c0_i32_0 = arith.constant 0 : i32
    %c0_i32_1 = arith.constant 0 : i32
    return %c0_i32, %c0_i32_0 : i32, i32
  }
  func.func @transform_3(%arg0: i32) -> (i32, i32) {
    %c0_i32 = arith.constant 0 : i32
    %c0_i32_0 = arith.constant 0 : i32
    return %arg0, %c0_i32 : i32, i32
  }
  func.func @transform_4(%arg0: i32) -> (i32, i32) {
    %c0_i32 = arith.constant 0 : i32
    %c0_i32_0 = arith.constant 0 : i32
    return %arg0, %c0_i32 : i32, i32
  }
}

module attributes {stable_mosaic.version = 11 : i64} {
  func.func @_qkv_proj_kernel(%arg0: i32, %arg1: memref<8x32xf32, #tpu.memory_space<vmem>>, %arg2: memref<32x96xf32, #tpu.memory_space<vmem>>, %arg3: memref<1x96xf32, #tpu.memory_space<vmem>>, %arg4: memref<8x32xf32, #tpu.memory_space<vmem>>, %arg5: memref<8x64xf32, #tpu.memory_space<vmem>>) attributes {dimension_semantics = [#tpu.dimension_semantics<parallel>], iteration_bounds = array<i64: 1>, scalar_prefetch = 0 : i64, scratch_operands = 0 : i64, tpu.core_type = #tpu.core_type<tc>, window_params = [{transform_indices = @transform_0, window_bounds = array<i64: 8, 32>}, {pipeline_mode = #tpu.pipeline_mode<synchronous>, transform_indices = @transform_1, window_bounds = array<i64: 32, 96>}, {pipeline_mode = #tpu.pipeline_mode<synchronous>, transform_indices = @transform_2, window_bounds = array<i64: 1, 96>}, {transform_indices = @transform_3, window_bounds = array<i64: 8, 32>}, {transform_indices = @transform_4, window_bounds = array<i64: 8, 64>}]} {
    %c0 = arith.constant 0 : index
    %c0_0 = arith.constant 0 : index
    %0 = vector.load %arg1[%c0, %c0_0] : memref<8x32xf32, #tpu.memory_space<vmem>>, vector<8x32xf32>
    %c0_1 = arith.constant 0 : index
    %c0_2 = arith.constant 0 : index
    %1 = vector.load %arg2[%c0_1, %c0_2] : memref<32x96xf32, #tpu.memory_space<vmem>>, vector<32x96xf32>
    %cst = arith.constant dense<0.000000e+00> : vector<8x96xf32>
    %2 = tpu.matmul %0, %1, %cst {dimension_numbers = #tpu.dot_dimension_numbers<[1], [0], [0], [1], [0, 0, 1, 1], [], []>} : vector<8x32xf32>, vector<32x96xf32>, vector<8x96xf32> -> vector<8x96xf32>
    %c0_3 = arith.constant 0 : index
    %c0_4 = arith.constant 0 : index
    %3 = vector.load %arg3[%c0_3, %c0_4] : memref<1x96xf32, #tpu.memory_space<vmem>>, vector<1x96xf32>
    %4 = vector.broadcast %3 : vector<1x96xf32> to vector<8x96xf32>
    %5 = arith.addf %2, %4 : vector<8x96xf32>
    %6 = vector.extract_strided_slice %5 {offsets = [0, 0], sizes = [8, 32], strides = [1, 1]} : vector<8x96xf32> to vector<8x32xf32>
    %c0_5 = arith.constant 0 : index
    %c0_6 = arith.constant 0 : index
    %7 = vector.load %arg4[%c0_5, %c0_6] : memref<8x32xf32, #tpu.memory_space<vmem>>, vector<8x32xf32>
    tpu.vector_store %arg4[%c0_5, %c0_6], %6 {strides = array<i32>} : memref<8x32xf32, #tpu.memory_space<vmem>>, vector<8x32xf32>,
    %8 = vector.extract_strided_slice %5 {offsets = [0, 32], sizes = [8, 64], strides = [1, 1]} : vector<8x96xf32> to vector<8x64xf32>
    %c0_7 = arith.constant 0 : index
    %c0_8 = arith.constant 0 : index
    %9 = vector.load %arg5[%c0_7, %c0_8] : memref<8x64xf32, #tpu.memory_space<vmem>>, vector<8x64xf32>
    tpu.vector_store %arg5[%c0_7, %c0_8], %8 {strides = array<i32>} : memref<8x64xf32, #tpu.memory_space<vmem>>, vector<8x64xf32>,
    return
  }
  func.func @transform_0(%arg0: i32) -> (i32, i32) {
    %c0_i32 = arith.constant 0 : i32
    %c0_i32_0 = arith.constant 0 : i32
    return %arg0, %c0_i32 : i32, i32
  }
  func.func @transform_1(%arg0: i32) -> (i32, i32) {
    %c0_i32 = arith.constant 0 : i32
    %c0_i32_0 = arith.constant 0 : i32
    %c0_i32_1 = arith.constant 0 : i32
    return %c0_i32, %c0_i32_0 : i32, i32
  }
  func.func @transform_2(%arg0: i32) -> (i32, i32) {
    %c0_i32 = arith.constant 0 : i32
    %c0_i32_0 = arith.constant 0 : i32
    %c0_i32_1 = arith.constant 0 : i32
    return %c0_i32, %c0_i32_0 : i32, i32
  }
  func.func @transform_3(%arg0: i32) -> (i32, i32) {
    %c0_i32 = arith.constant 0 : i32
    %c0_i32_0 = arith.constant 0 : i32
    return %arg0, %c0_i32 : i32, i32
  }
  func.func @transform_4(%arg0: i32) -> (i32, i32) {
    %c0_i32 = arith.constant 0 : i32
    %c0_i32_0 = arith.constant 0 : i32
    return %arg0, %c0_i32 : i32, i32
  }
}

</mosaic_0001>

<bundles_post_ra>
// kernel: tpu_custom_call.1
= control target key start
LH: loop header
LB: loop body
LE: loop exit
PB: predicated region body
PF: predicated region fallthrough
CT: control target
= control target key end

     0   :  { %10 = vsyncpa [#allocation3], 0  ;;  %s282_s0 = inlined_call_operand.hbm [shape: f32[8,32], index: 0, kind: input, shape index: {}]   ;;  %s283_s1 = inlined_call_operand.hbm [shape: f32[32,96], index: 1, kind: input, shape index: {}]   ;;  %s284_s2 = inlined_call_operand.vmem [shape: f32[1,96], index: 2, kind: input, shape index: {}]   ;;  %s285_s3 = inlined_call_operand.hbm [shape: f32[8,32], index: 3, kind: output, shape index: {0}]   ;;  %s286_s4 = inlined_call_operand.hbm [shape: f32[8,64], index: 4, kind: output, shape index: {1}]  }
   0x1   :  { %11 = vsyncpa [#allocation6], 0 }
   0x2   :  { %12 = vsyncpa [#allocation4], 0 }
   0x3   :  { %13 = vsyncpa [#allocation9], 0  ;;  %s19_s17 = sshll.u32 %s282_s0, 4  ;;  %s235_s18 = smov [#allocation2]   ;;  %s20_s17 = int_to_ptr.hbm [resolvable:$true] %s19_s17 }
   0x4   :  { %s21_s19 = sshll.u32 %s235_s18, 4  ;;  %s29_s22 = sshll.u32 %s283_s1, 4  ;;  %s22_s19 = int_to_ptr.vmem [resolvable:$true] %s21_s19  ;;  %s30_s22 = int_to_ptr.hbm [resolvable:$true] %s29_s22 }
   0x5   :  { %24 = dma.hbm_to_vmem [thread:$0]  %s20_s17, 128, %s22_s19, [#allocation3]  }
   0x6   :  { %s236_s23 = smov [#allocation5]   ;;  %s237_s25 = smov 128  }
   0x7   :  { %s31_s24 = sshll.u32 %s236_s23, 4  ;;  %s238_s26 = smov 8   ;;  %s32_s24 = int_to_ptr.vmem [resolvable:$true] %s31_s24 }
   0x8   :  { %37 = dma.hbm_to_vmem [thread:$0]  %s30_s22, 512, %s32_s24, [#allocation6], %s237_s25, %s237_s25, %s238_s26  }
   0x9   :  { %227 = dma.done.wait [#allocation3], 128  }
   0xa   :  { %228 = vsyncadd [#allocation3], 4294967168 }
   0xb   :  { %229 = dma.done.wait [#allocation6], 512  }
   0xc   :  { %230 = vsyncadd [#allocation6], 4294966784  ;;  %v52_v0 = vld [vmem:[#allocation5 + $0x18] sm:$0xff]  ;;  %v51_v1 = vld [vmem:[#allocation5 + $0x10] sm:$0xff]  ;;  %vm57_vm0 = vcmask 261120   ;;  %s239_s27 = smov [#allocation7]  }
   0xd   :  { %73 = vmatpush.msra.mxu0 %v52_v0  ;;  %v50_v2 = vld [vmem:[#allocation5 + $0x8] sm:$0xff]  ;;  %v49_v3 = vld [vmem:[#allocation5] sm:$0xff]  ;;  %v48_v4 = vld [vmem:[#allocation2] sm:$0xff]  ;;  %s93_s28 = sshll.u32 %s239_s27, 4  ;;  %s95_s5 = sshll.u32 %s285_s3, 4  ;;  %vm86_vm1 = vcmask 523264   ;;  %s94_s28 = int_to_ptr.vmem [resolvable:$true] %s93_s28  ;;  %s96_s5 = int_to_ptr.hbm [resolvable:$true] %s95_s5 }
   0xe   :  { %v130_v5 = vld [vmem:[%s284_s2] ss:$0 sm:$0xff]  ;;  %s240_s6 = smov 96   ;;  %s241_s7 = smov [#allocation8]  }
   0xf   :  { %74 = vmatpush.msra.mxu0 %v51_v1  ;;  %s104_s8 = sshll.u32 %s241_s7, 4  ;;  %s106_s2 = sshll.u32 %s286_s4, 4  ;;  %s105_s8 = int_to_ptr.vmem [resolvable:$true] %s104_s8  ;;  %s107_s2 = int_to_ptr.hbm [resolvable:$true] %s106_s2 }
  0x11   :  { %75 = vmatpush.msra.mxu0 %v50_v2 }
  0x13   :  { %76 = vmatpush.msra.mxu0 %v49_v3 }
  0x14   :  { %122 = vmatmul.msk.f32.vlgmr.msra.gmra.mxu0 %vm57_vm0, %v48_v4 }
  0x91   :  { %v78_v6 = vpop.f32.mrf.mxu0 }
  0x92   :  { %v79_v7 = vadd.f32 %v130_v5, %v78_v6 }
  0x94   :  { %81 = vst.msk [vmem:[#allocation7] sm:$0xff] %vm57_vm0, %v79_v7  ;;  %83 = vrot.lane.b32.xlu0 %v79_v7, %s240_s6 }
  0x95   :  { %98 = dma.vmem_to_hbm [thread:$0]  %s94_s28, 128, %s96_s5, [#allocation4]  }
 0x106   :  { %v84_v8 = vpop.permute.xlu0 %83 }
 0x107   :  { %87 = vst.msk [vmem:[#allocation8] sm:$0xff] %vm86_vm1, %v84_v8 }
 0x108   :  { %109 = dma.vmem_to_hbm [thread:$0]  %s105_s8, 128, %s107_s2, [#allocation9]  }
 0x109   :  { %231 = dma.done.wait [#allocation4], 128  }
 0x10a   :  { %232 = vsyncadd [#allocation4], 4294967168 }
 0x10b   :  { %233 = dma.done.wait [#allocation9], 128  }
 0x10c   :  { %234 = vsyncadd [#allocation9], 4294967168 }
 0x10d   :  { %118 = vsyncpa [#allocation3], 1 }
 0x10e   :  { %119 = vsyncpa [#allocation6], 1 }
 0x10f   :  { %120 = vsyncpa [#allocation4], 1 }
 0x110   :  { %121 = vsyncpa [#allocation9], 1 }

// kernel: tpu_custom_call.1
= control target key start
LH: loop header
LB: loop body
LE: loop exit
PB: predicated region body
PF: predicated region fallthrough
CT: control target
= control target key end

     0   :  { %10 = vsyncpa [#allocation3], 0  ;;  %s282_s0 = inlined_call_operand.hbm [shape: f32[8,32], index: 0, kind: input, shape index: {}]   ;;  %s283_s1 = inlined_call_operand.hbm [shape: f32[32,96], index: 1, kind: input, shape index: {}]   ;;  %s284_s2 = inlined_call_operand.vmem [shape: f32[1,96], index: 2, kind: input, shape index: {}]   ;;  %s285_s3 = inlined_call_operand.hbm [shape: f32[8,32], index: 3, kind: output, shape index: {0}]   ;;  %s286_s4 = inlined_call_operand.hbm [shape: f32[8,64], index: 4, kind: output, shape index: {1}]  }
   0x1   :  { %11 = vsyncpa [#allocation6], 0 }
   0x2   :  { %12 = vsyncpa [#allocation4], 0 }
   0x3   :  { %13 = vsyncpa [#allocation9], 0  ;;  %s19_s17 = sshll.u32 %s282_s0, 4  ;;  %s235_s18 = smov [#allocation2]   ;;  %s20_s17 = int_to_ptr.hbm [resolvable:$true] %s19_s17 }
   0x4   :  { %s21_s19 = sshll.u32 %s235_s18, 4  ;;  %s29_s22 = sshll.u32 %s283_s1, 4  ;;  %s22_s19 = int_to_ptr.vmem [resolvable:$true] %s21_s19  ;;  %s30_s22 = int_to_ptr.hbm [resolvable:$true] %s29_s22 }
   0x5   :  { %24 = dma.hbm_to_vmem [thread:$0]  %s20_s17, 128, %s22_s19, [#allocation3]  }
   0x6   :  { %s236_s23 = smov [#allocation5]   ;;  %s237_s25 = smov 128  }
   0x7   :  { %s31_s24 = sshll.u32 %s236_s23, 4  ;;  %s238_s26 = smov 8   ;;  %s32_s24 = int_to_ptr.vmem [resolvable:$true] %s31_s24 }
   0x8   :  { %37 = dma.hbm_to_vmem [thread:$0]  %s30_s22, 512, %s32_s24, [#allocation6], %s237_s25, %s237_s25, %s238_s26  }
   0x9   :  { %227 = dma.done.wait [#allocation3], 128  }
   0xa   :  { %228 = vsyncadd [#allocation3], 4294967168 }
   0xb   :  { %229 = dma.done.wait [#allocation6], 512  }
   0xc   :  { %230 = vsyncadd [#allocation6], 4294966784  ;;  %v52_v0 = vld [vmem:[#allocation5 + $0x18] sm:$0xff]  ;;  %v51_v1 = vld [vmem:[#allocation5 + $0x10] sm:$0xff]  ;;  %vm57_vm0 = vcmask 261120   ;;  %s239_s27 = smov [#allocation7]  }
   0xd   :  { %73 = vmatpush.msra.mxu0 %v52_v0  ;;  %v50_v2 = vld [vmem:[#allocation5 + $0x8] sm:$0xff]  ;;  %v49_v3 = vld [vmem:[#allocation5] sm:$0xff]  ;;  %v48_v4 = vld [vmem:[#allocation2] sm:$0xff]  ;;  %s93_s28 = sshll.u32 %s239_s27, 4  ;;  %s95_s5 = sshll.u32 %s285_s3, 4  ;;  %vm86_vm1 = vcmask 523264   ;;  %s94_s28 = int_to_ptr.vmem [resolvable:$true] %s93_s28  ;;  %s96_s5 = int_to_ptr.hbm [resolvable:$true] %s95_s5 }
   0xe   :  { %v130_v5 = vld [vmem:[%s284_s2] ss:$0 sm:$0xff]  ;;  %s240_s6 = smov 96   ;;  %s241_s7 = smov [#allocation8]  }
   0xf   :  { %74 = vmatpush.msra.mxu0 %v51_v1  ;;  %s104_s8 = sshll.u32 %s241_s7, 4  ;;  %s106_s2 = sshll.u32 %s286_s4, 4  ;;  %s105_s8 = int_to_ptr.vmem [resolvable:$true] %s104_s8  ;;  %s107_s2 = int_to_ptr.hbm [resolvable:$true] %s106_s2 }
  0x11   :  { %75 = vmatpush.msra.mxu0 %v50_v2 }
  0x13   :  { %76 = vmatpush.msra.mxu0 %v49_v3 }
  0x14   :  { %122 = vmatmul.msk.f32.vlgmr.msra.gmra.mxu0 %vm57_vm0, %v48_v4 }
  0x91   :  { %v78_v6 = vpop.f32.mrf.mxu0 }
  0x92   :  { %v79_v7 = vadd.f32 %v130_v5, %v78_v6 }
  0x94   :  { %81 = vst.msk [vmem:[#allocation7] sm:$0xff] %vm57_vm0, %v79_v7  ;;  %83 = vrot.lane.b32.xlu0 %v79_v7, %s240_s6 }
  0x95   :  { %98 = dma.vmem_to_hbm [thread:$0]  %s94_s28, 128, %s96_s5, [#allocation4]  }
 0x106   :  { %v84_v8 = vpop.permute.xlu0 %83 }
 0x107   :  { %87 = vst.msk [vmem:[#allocation8] sm:$0xff] %vm86_vm1, %v84_v8 }
 0x108   :  { %109 = dma.vmem_to_hbm [thread:$0]  %s105_s8, 128, %s107_s2, [#allocation9]  }
 0x109   :  { %231 = dma.done.wait [#allocation4], 128  }
 0x10a   :  { %232 = vsyncadd [#allocation4], 4294967168 }
 0x10b   :  { %233 = dma.done.wait [#allocation9], 128  }
 0x10c   :  { %234 = vsyncadd [#allocation9], 4294967168 }
 0x10d   :  { %118 = vsyncpa [#allocation3], 1 }
 0x10e   :  { %119 = vsyncpa [#allocation6], 1 }
 0x10f   :  { %120 = vsyncpa [#allocation4], 1 }
 0x110   :  { %121 = vsyncpa [#allocation9], 1 }

</bundles_post_ra>
